<compile_context>
chip_gen: v7x
topology: tpu7x:2x2x1
jax: 0.10.0
libtpu: 0.0.40
codegen_flags: <defaults>
</compile_context>

<pallas_src>
import jax
import jax.numpy as jnp
from jax.experimental import pallas as pl
from jax.experimental.pallas import tpu as pltpu


def _attn_pool_kernel(x_ref, mask_ref, w1_ref, b1_ref, w2_ref, o_ref):
    # x_ref:    (TB, S, H)   TB batch elements of the current grid step
    # mask_ref: (1, 1, TB*S) lane-dense mask row (already scaled by exp(b2))
    # w1_ref:   (H, H)       fc1 weight, (in, out)
    # b1_ref:   (1, H)
    # w2_ref:   (1, H)       fc2 weight as a lane-dense row
    # o_ref:    (TB, H)
    TB, S, H = x_ref.shape
    R = TB * S

    x = x_ref[...]                               # (TB, S, H), native dtype
    x2d = x.reshape(R, H)                        # merge leading dims (S % 8 == 0 -> cheap)

    # ---- fc1 + tanh: one big MXU matmul with f32 accumulate ----------------
    e = jnp.tanh(
        jnp.dot(x2d, w1_ref[...], preferred_element_type=jnp.float32)
        + b1_ref[...]
    )                                            # (R, H) f32

    # ---- fc2 (H -> 1) as VPU multiply + lane reduction (no N=1 MXU matmul) -
    # No max-subtraction, to match the PyTorch module; exp(b2) is folded into
    # the mask by the wrapper.
    logits = jnp.sum(e * w2_ref[...], axis=-1, keepdims=True)       # (R, 1)
    alpha = jnp.exp(logits)                                         # (R, 1) f32

    # ---- per-row weights applied to x (elementwise in f32) -----------------
    xw = x2d.astype(jnp.float32) * alpha                            # (R, H) f32

    # ---- masked per-batch segment-sum as a block-diagonal matmul -----------
    # q[t, j] = mask[j] if row j belongs to batch t of this block, else 0
    row = jax.lax.broadcasted_iota(jnp.int32, (TB, R), 0)
    col = jax.lax.broadcasted_iota(jnp.int32, (TB, R), 1)
    in_group = jnp.logical_and(col >= row * S, col < (row + 1) * S)
    q = in_group.astype(jnp.float32) * mask_ref[0]                  # (TB, R)

    num = jnp.dot(q, xw, preferred_element_type=jnp.float32)        # (TB, H)
    den = jnp.dot(q, alpha, preferred_element_type=jnp.float32) + 1e-8  # (TB, 1)

    o_ref[...] = (num / den).astype(o_ref.dtype)


def prepare_attention_pooling_params(w1, b1, w2, b2, dtype=jnp.float32):
    """Convert torch-layout Linear params to the kernel layout.  Call ONCE
    (hoists transposes/reshapes out of the per-call hot path)."""
    w1 = jnp.asarray(w1)
    h = w1.shape[1]
    return {
        "w1": jnp.asarray(w1, dtype).T,                      # (H, H)  (in, out)
        "b1": jnp.asarray(b1, jnp.float32).reshape(1, h),    # (1, H)
        "w2": jnp.asarray(w2, jnp.float32).reshape(1, h),    # (1, H) lane-dense row
        # exp(b2) is a constant multiplicative factor on alpha; fold it into
        # the mask (exact vs the PyTorch graph, including the 1e-8 epsilon).
        "exp_b2": jnp.exp(jnp.asarray(b2, jnp.float32)).reshape(()),
    }


def _choose_block_b(B, S, H, itemsize, requested=None):
    if requested is not None:
        tb = int(requested)
    else:
        # Fill the MXU M dimension (256 rows on v6e/v7x, 128 on v5e) and
        # amortize per-grid-step overhead, but keep the (double-buffered)
        # x tile within a conservative VMEM budget (works on v7x's 64 MiB).
        tb = max(1, pl.cdiv(256, S))
        tb = min(tb, max(1, (4 * 1024 * 1024) // max(S * H * itemsize, 1)))
    if tb >= B:
        return B                       # single grid step; block == full batch dim
    tb = max(8, (tb // 8) * 8)         # (TB, S)/(TB, H) blocks need TB % 8 == 0
    return B if tb >= B else tb


def attention_pooling(x, params, attn_mask=None, *, block_b=None):
    """x: (B, S, H); params from prepare_attention_pooling_params;
    attn_mask: optional (B, S) (or (B, S, 1)).  Returns (B, H) in x.dtype."""
    B, S, H = x.shape
    TB = _choose_block_b(B, S, H, x.dtype.itemsize, block_b)
    G = pl.cdiv(B, TB)
    Bp = G * TB

    if Bp != B:
        x = jnp.pad(x, ((0, Bp - B), (0, 0), (0, 0)))

    exp_b2 = params["exp_b2"]
    if attn_mask is None:
        mask = jnp.full((Bp, S), exp_b2, jnp.float32)
    else:
        mask = jnp.asarray(attn_mask, jnp.float32).reshape(B, S) * exp_b2
        if Bp != B:
            mask = jnp.pad(mask, ((0, Bp - B), (0, 0)))
    # Lane-dense layout: one (1, TB*S) row of mask values per grid step.
    mask = mask.reshape(G, 1, TB * S)

    out = pl.pallas_call(
        _attn_pool_kernel,
        out_shape=jax.ShapeDtypeStruct((Bp, H), x.dtype),
        grid_spec=pltpu.PrefetchScalarGridSpec(
            num_scalar_prefetch=0,
            grid=(G,),
            in_specs=[
                pl.BlockSpec((TB, S, H), lambda b: (b, 0, 0)),      # x
                pl.BlockSpec((1, 1, TB * S), lambda b: (b, 0, 0)),  # mask row
                pl.BlockSpec((H, H), lambda b: (0, 0)),             # w1 (in, out)
                pl.BlockSpec((1, H), lambda b: (0, 0)),             # b1
                pl.BlockSpec((1, H), lambda b: (0, 0)),             # w2 row
            ],
            out_specs=pl.BlockSpec((TB, H), lambda b: (b, 0)),      # lane-dense out
        ),
        compiler_params=pltpu.CompilerParams(
            dimension_semantics=("parallel",),
            vmem_limit_bytes=48 * 1024 * 1024,
        ),
    )(x, mask, params["w1"], params["b1"], params["w2"])

    return out[:B]


def _reference(x, w1, b1, w2, b2, attn_mask=None):
    # pure-JAX replica of the PyTorch forward, for verification
    e = jnp.tanh(jnp.einsum("bsh,oh->bso", x, w1) + b1)
    alpha = jnp.exp(jnp.einsum("bsh,oh->bso", e, w2) + b2)     # (B, S, 1)
    if attn_mask is not None:
        alpha = alpha * attn_mask[:, :, None]
    alpha = alpha / (jnp.sum(alpha, axis=1, keepdims=True) + 1e-8)
    pooled = jnp.einsum("bsh,bso->bho", x, alpha)              # (B, H, 1)
    return pooled.reshape(x.shape[0], -1)


if __name__ == "__main__":
    B, S, H = 2, 8, 32

    key = jax.random.PRNGKey(0)
    kx, kw1, kw2, km, kx2, km2 = jax.random.split(key, 6)

    x = jax.random.normal(kx, (B, S, H), dtype=jnp.float32)

    # AttentionPooling.init_weights: Linear.weight ~ N(0, 0.02), bias = 0
    w1 = 0.02 * jax.random.normal(kw1, (H, H), dtype=jnp.float32)   # fc1 (out, in)
    b1 = jnp.zeros((H,), dtype=jnp.float32)
    w2 = 0.02 * jax.random.normal(kw2, (1, H), dtype=jnp.float32)   # fc2 (out, in)
    b2 = jnp.zeros((1,), dtype=jnp.float32)

    attn_mask = (jax.random.uniform(km, (B, S)) > 0.2).astype(jnp.float32)

    params = prepare_attention_pooling_params(w1, b1, w2, b2)

    # masked path
    out = jax.block_until_ready(attention_pooling(x, params, attn_mask))
    ref = _reference(x, w1, b1, w2, b2, attn_mask)
    assert out.shape == (B, H)
    assert jnp.allclose(out, ref, atol=1e-5, rtol=1e-5), "mismatch vs reference (masked)"

    # attn_mask=None path
    out_nm = jax.block_until_ready(attention_pooling(x, params))
    assert jnp.allclose(out_nm, _reference(x, w1, b1, w2, b2),
                        atol=1e-5, rtol=1e-5), "mismatch vs reference (no mask)"

    # multi-grid-step path: batch not a multiple of the batch block
    # (exercises TB=8 blocks, batch padding and the parallel grid axis)
    B2 = 20
    x2 = jax.random.normal(kx2, (B2, S, H), dtype=jnp.float32)
    m2 = (jax.random.uniform(km2, (B2, S)) > 0.2).astype(jnp.float32)
    out2 = jax.block_until_ready(attention_pooling(x2, params, m2, block_b=8))
    ref2 = _reference(x2, w1, b1, w2, b2, m2)
    assert out2.shape == (B2, H)
    assert jnp.allclose(out2, ref2, atol=1e-5, rtol=1e-5), "mismatch vs reference (batched)"

    # bf16 fast path for the fc1 MXU matmul (halves x HBM traffic, 2x MXU rate
    # on v6e/v7x); elementwise math stays f32 inside the kernel.
    params_bf16 = prepare_attention_pooling_params(w1, b1, w2, b2, dtype=jnp.bfloat16)
    out_bf16 = jax.block_until_ready(
        attention_pooling(x.astype(jnp.bfloat16), params_bf16, attn_mask))
    assert jnp.allclose(out_bf16.astype(jnp.float32), ref,
                        atol=5e-2, rtol=5e-2), "mismatch vs reference (bf16)"

    print("KERNEL_OK")
</pallas_src>

<mosaic_0001>
module attributes {stable_mosaic.version = 11 : i64} {
  func.func @_attn_pool_kernel(%arg0: i32, %arg1: memref<2x8x32xf32, #tpu.memory_space<vmem>>, %arg2: memref<1x1x16xf32, #tpu.memory_space<vmem>>, %arg3: memref<32x32xf32, #tpu.memory_space<vmem>>, %arg4: memref<1x32xf32, #tpu.memory_space<vmem>>, %arg5: memref<1x32xf32, #tpu.memory_space<vmem>>, %arg6: memref<2x32xf32, #tpu.memory_space<vmem>>) attributes {dimension_semantics = [#tpu.dimension_semantics<parallel>], iteration_bounds = array<i64: 1>, scalar_prefetch = 0 : i64, scratch_operands = 0 : i64, tpu.core_type = #tpu.core_type<tc>, window_params = [{transform_indices = @transform_0, window_bounds = array<i64: 2, 8, 32>}, {transform_indices = @transform_1, window_bounds = array<i64: 1, 1, 16>}, {pipeline_mode = #tpu.pipeline_mode<synchronous>, transform_indices = @transform_2, window_bounds = array<i64: 32, 32>}, {pipeline_mode = #tpu.pipeline_mode<synchronous>, transform_indices = @transform_3, window_bounds = array<i64: 1, 32>}, {pipeline_mode = #tpu.pipeline_mode<synchronous>, transform_indices = @transform_4, window_bounds = array<i64: 1, 32>}, {transform_indices = @transform_5, window_bounds = array<i64: 2, 32>}]} {
    %c0 = arith.constant 0 : index
    %c0_0 = arith.constant 0 : index
    %c0_1 = arith.constant 0 : index
    %0 = vector.load %arg1[%c0, %c0_0, %c0_1] : memref<2x8x32xf32, #tpu.memory_space<vmem>>, vector<2x8x32xf32>
    %1 = vector.shape_cast %0 : vector<2x8x32xf32> to vector<16x32xf32>
    %c0_2 = arith.constant 0 : index
    %c0_3 = arith.constant 0 : index
    %2 = vector.load %arg3[%c0_2, %c0_3] : memref<32x32xf32, #tpu.memory_space<vmem>>, vector<32x32xf32>
    %cst = arith.constant dense<0.000000e+00> : vector<16x32xf32>
    %3 = tpu.matmul %1, %2, %cst {dimension_numbers = #tpu.dot_dimension_numbers<[1], [0], [0], [1], [0, 0, 1, 1], [], []>} : vector<16x32xf32>, vector<32x32xf32>, vector<16x32xf32> -> vector<16x32xf32>
    %c0_4 = arith.constant 0 : index
    %c0_5 = arith.constant 0 : index
    %4 = vector.load %arg4[%c0_4, %c0_5] : memref<1x32xf32, #tpu.memory_space<vmem>>, vector<1x32xf32>
    %5 = vector.broadcast %4 : vector<1x32xf32> to vector<16x32xf32>
    %6 = arith.addf %3, %5 : vector<16x32xf32>
    %7 = math.tanh %6 : vector<16x32xf32>
    %c0_6 = arith.constant 0 : index
    %c0_7 = arith.constant 0 : index
    %8 = vector.load %arg5[%c0_6, %c0_7] : memref<1x32xf32, #tpu.memory_space<vmem>>, vector<1x32xf32>
    %9 = vector.broadcast %8 : vector<1x32xf32> to vector<16x32xf32>
    %10 = arith.mulf %7, %9 : vector<16x32xf32>
    %cst_8 = arith.constant dense<0.000000e+00> : vector<16xf32>
    %11 = vector.multi_reduction <add>, %10, %cst_8 [1] : vector<16x32xf32> to vector<16xf32>
    %12 = vector.shape_cast %11 : vector<16xf32> to vector<16x1xf32>
    %13 = math.exp %12 : vector<16x1xf32>
    %14 = vector.broadcast %13 : vector<16x1xf32> to vector<16x32xf32>
    %15 = arith.mulf %1, %14 : vector<16x32xf32>
    %16 = tpu.iota {dimensions = array<i32: 0>} : vector<2x16xi32>
    %17 = tpu.iota {dimensions = array<i32: 1>} : vector<2x16xi32>
    %c8_i32 = arith.constant 8 : i32
    %18 = vector.broadcast %c8_i32 : i32 to vector<2x16xi32>
    %19 = arith.muli %16, %18 : vector<2x16xi32>
    %20 = arith.cmpi sge, %17, %19 : vector<2x16xi32>
    %c1_i32 = arith.constant 1 : i32
    %21 = vector.broadcast %c1_i32 : i32 to vector<2x16xi32>
    %22 = arith.addi %16, %21 : vector<2x16xi32>
    %c8_i32_9 = arith.constant 8 : i32
    %23 = vector.broadcast %c8_i32_9 : i32 to vector<2x16xi32>
    %24 = arith.muli %22, %23 : vector<2x16xi32>
    %25 = arith.cmpi slt, %17, %24 : vector<2x16xi32>
    %26 = arith.andi %20, %25 : vector<2x16xi1>
    %27 = arith.extui %26 : vector<2x16xi1> to vector<2x16xi32>
    %28 = arith.sitofp %27 : vector<2x16xi32> to vector<2x16xf32>
    %c0_10 = arith.constant 0 : index
    %c0_11 = arith.constant 0 : index
    %c0_12 = arith.constant 0 : index
    %29 = vector.load %arg2[%c0_10, %c0_11, %c0_12] : memref<1x1x16xf32, #tpu.memory_space<vmem>>, vector<1x1x16xf32>
    %30 = vector.shape_cast %29 : vector<1x1x16xf32> to vector<1x16xf32>
    %31 = vector.broadcast %30 : vector<1x16xf32> to vector<2x16xf32>
    %32 = arith.mulf %28, %31 : vector<2x16xf32>
    %cst_13 = arith.constant dense<0.000000e+00> : vector<2x32xf32>
    %33 = tpu.matmul %32, %15, %cst_13 {dimension_numbers = #tpu.dot_dimension_numbers<[1], [0], [0], [1], [0, 0, 1, 1], [], []>} : vector<2x16xf32>, vector<16x32xf32>, vector<2x32xf32> -> vector<2x32xf32>
    %cst_14 = arith.constant dense<0.000000e+00> : vector<2x1xf32>
    %34 = tpu.matmul %32, %13, %cst_14 {dimension_numbers = #tpu.dot_dimension_numbers<[1], [0], [0], [1], [0, 0, 1, 1], [], []>} : vector<2x16xf32>, vector<16x1xf32>, vector<2x1xf32> -> vector<2x1xf32>
    %cst_15 = arith.constant 9.99999993E-9 : f32
    %35 = vector.broadcast %cst_15 : f32 to vector<2x1xf32>
    %36 = arith.addf %34, %35 : vector<2x1xf32>
    %37 = vector.broadcast %36 : vector<2x1xf32> to vector<2x32xf32>
    %38 = arith.divf %33, %37 : vector<2x32xf32>
    %c0_16 = arith.constant 0 : index
    %c0_17 = arith.constant 0 : index
    %39 = vector.load %arg6[%c0_16, %c0_17] : memref<2x32xf32, #tpu.memory_space<vmem>>, vector<2x32xf32>
    tpu.vector_store %arg6[%c0_16, %c0_17], %38 {strides = array<i32>} : memref<2x32xf32, #tpu.memory_space<vmem>>, vector<2x32xf32>,
    return
  }
  func.func @transform_0(%arg0: i32) -> (i32, i32, i32) {
    %c0_i32 = arith.constant 0 : i32
    %c0_i32_0 = arith.constant 0 : i32
    %c0_i32_1 = arith.constant 0 : i32
    return %arg0, %c0_i32, %c0_i32_0 : i32, i32, i32
  }
  func.func @transform_1(%arg0: i32) -> (i32, i32, i32) {
    %c0_i32 = arith.constant 0 : i32
    %c0_i32_0 = arith.constant 0 : i32
    %c0_i32_1 = arith.constant 0 : i32
    return %arg0, %c0_i32, %c0_i32_0 : i32, i32, i32
  }
  func.func @transform_2(%arg0: i32) -> (i32, i32) {
    %c0_i32 = arith.constant 0 : i32
    %c0_i32_0 = arith.constant 0 : i32
    %c0_i32_1 = arith.constant 0 : i32
    return %c0_i32, %c0_i32_0 : i32, i32
  }
  func.func @transform_3(%arg0: i32) -> (i32, i32) {
    %c0_i32 = arith.constant 0 : i32
    %c0_i32_0 = arith.constant 0 : i32
    %c0_i32_1 = arith.constant 0 : i32
    return %c0_i32, %c0_i32_0 : i32, i32
  }
  func.func @transform_4(%arg0: i32) -> (i32, i32) {
    %c0_i32 = arith.constant 0 : i32
    %c0_i32_0 = arith.constant 0 : i32
    %c0_i32_1 = arith.constant 0 : i32
    return %c0_i32, %c0_i32_0 : i32, i32
  }
  func.func @transform_5(%arg0: i32) -> (i32, i32) {
    %c0_i32 = arith.constant 0 : i32
    %c0_i32_0 = arith.constant 0 : i32
    return %arg0, %c0_i32 : i32, i32
  }
}

</mosaic_0001>

<bundles_post_ra>
// kernel: tpu_custom_call.1
= control target key start
LH: loop header
LB: loop body
LE: loop exit
PB: predicated region body
PF: predicated region fallthrough
CT: control target
= control target key end

     0   :  { %10 = vsyncpa [#allocation3], 0  ;;  %s598_s0 = inlined_call_operand.hbm [shape: f32[2,8,32], index: 0, kind: input, shape index: {}]   ;;  %s599_s1 = inlined_call_operand.vmem [shape: f32[1,1,16], index: 1, kind: input, shape index: {}]   ;;  %s600_s2 = inlined_call_operand.hbm [shape: f32[32,32], index: 2, kind: input, shape index: {}]   ;;  %s601_s3 = inlined_call_operand.vmem [shape: f32[1,32], index: 3, kind: input, shape index: {}]   ;;  %s602_s4 = inlined_call_operand.vmem [shape: f32[1,32], index: 4, kind: input, shape index: {}]   ;;  %s603_s5 = inlined_call_operand.hbm [shape: f32[2,32], index: 5, kind: output, shape index: {}]  }
   0x1   :  { %11 = vsyncpa [#allocation6], 0 }
   0x2   :  { %12 = vsyncpa [#allocation4], 0  ;;  %s508_s18 = smov [#allocation2]   ;;  %s436_s22 = scalar_lea.hbm %s598_s0, 256 }
   0x3   :  { %s18_s19 = sshll.u32 %s508_s18, 4  ;;  %p437_p0 = scmp.ne.s32.totalorder %s598_s0, %s436_s22  ;;  %s19_s19 = int_to_ptr.vmem [resolvable:$true] %s18_s19 }
   0x4   :  { %p440_p1 = scmp.lt.u32.totalorder %s436_s22, %s598_s0 }
   0x6   :  { %p442_p2 = pnand %p440_p1, %p437_p0 }
   0x8   :  { %445 = shalt.err (!%p442_p2)
}
   0x9   :  { %s446_s27 = scalar_lea.vmem %s19_s19, 256  ;;  %p451_p4 = scmp.lt.s32.totalorder %s19_s19, %s19_s19 }
   0xa   :  { %p447_p3 = scmp.ne.s32.totalorder %s19_s19, %s446_s27  ;;  %p452_p5 = scmp.lt.s32.totalorder %s446_s27, %s446_s27 }
   0xc   :  { %p453_p6 = por %p452_p5, %p451_p4 }
   0xe   :  { %p454_p7 = pnand %p453_p6, %p447_p3 }
  0x10   :  { %457 = shalt.err (!%p454_p7)
}
  0x11   :  { %s509_s28 = smov 128   ;;  %s510_s29 = smov 8  }
  0x12   :  { %24 = dma.hbm_to_vmem [thread:$0]  %s598_s0, 256, %s19_s19, [#allocation3], %s509_s28, %s509_s28, %s510_s29  }
  0x13   :  { %s511_s7 = smov [#allocation5]   ;;  %s458_s11 = scalar_lea.hbm %s600_s2, 512 }
  0x14   :  { %s32_s8 = sshll.u32 %s511_s7, 4  ;;  %p459_p8 = scmp.ne.s32.totalorder %s600_s2, %s458_s11  ;;  %s33_s8 = int_to_ptr.vmem [resolvable:$true] %s32_s8 }
  0x15   :  { %p462_p9 = scmp.lt.u32.totalorder %s458_s11, %s600_s2 }
  0x17   :  { %p464_p10 = pnand %p462_p9, %p459_p8 }
  0x19   :  { %467 = shalt.err (!%p464_p10)
}
  0x1a   :  { %s468_s16 = scalar_lea.vmem %s33_s8, 512  ;;  %p473_p12 = scmp.lt.s32.totalorder %s33_s8, %s33_s8 }
  0x1b   :  { %p469_p11 = scmp.ne.s32.totalorder %s33_s8, %s468_s16  ;;  %p474_p13 = scmp.lt.s32.totalorder %s468_s16, %s468_s16 }
  0x1d   :  { %p475_p0 = por %p474_p13, %p473_p12 }
  0x1f   :  { %p476_p1 = pnand %p475_p0, %p469_p11 }
  0x21   :  { %479 = shalt.err (!%p476_p1)
}
  0x22   :  { %38 = dma.hbm_to_vmem [thread:$0]  %s600_s2, 512, %s33_s8, [#allocation6], %s509_s28, %s509_s28, %s510_s29  }
  0x23   :  { %502 = dma.done.wait [#allocation3], 256  }
  0x24   :  { %503 = vsyncadd [#allocation3], 4294967040 }
  0x25   :  { %504 = dma.done.wait [#allocation6], 512  }
  0x26   :  { %505 = vsyncadd [#allocation6], 4294966784  ;;  %vm62_vm0 = vcmask 261120   ;;  %v51_v0 = vld [vmem:[#allocation5] sm:$0xff]  ;;  %v52_v1 = vld [vmem:[#allocation5 + $0x8] sm:$0xff]  ;;  %v512_v20 = vmov 0.0|0.0   ;;  %v167_v22 = vlaneseq }
  0x27   :  { %v53_v2 = vld [vmem:[#allocation5 + $0x10] sm:$0xff]  ;;  %v401_v3 = vpack.c.bf16 %v52_v1, %v51_v0  ;;  %v54_v4 = vld [vmem:[#allocation5 + $0x18] sm:$0xff]  ;;  %409 = vmatprep.subr.bf16.mxu1 %v512_v20  ;;  %vm513_vm1 = vmmov 0   ;;  %v514_v21 = vmov 0.0   ;;  %vm187_vm5 = vcmask 130048  }
  0x28   :  { %v49_v5 = vld [vmem:[#allocation2] sm:$0xff]  ;;  %v405_v6 = vpack.c.bf16 %v54_v4, %v53_v2  ;;  %v50_v7 = vld [vmem:[#allocation2 + $0x8] sm:$0xff]  ;;  %391 = vmatprep.mubr.msk.f32.mxu1 %vm513_vm1, %v514_v21  ;;  %v168_v24 = vshrl.u32 %v167_v22, 7  ;;  %v170_v29 = vand.u32 127, %v167_v22  ;;  %v515_v41 = vmov 0  }
  0x29   :  { %384 = vmatprep.mubr.msk.f32.mxu0 %vm62_vm0, %v49_v5  ;;  %402 = vmatprep.subr.bf16.mxu0 %v401_v3  ;;  %v356_v8 = vld [vmem:[%s601_s3] ss:$0 sm:$0xff]  ;;  %vm338_vm6 = vcmask 254976  }
  0x2a   :  { %404 = vmatpush3.bf16.msra.mxu0 %v401_v3  ;;  %v359_v13 = vld [vmem:[%s602_s4] ss:$0 sm:$0xff]  ;;  %v173_v27 = vadd.s32 1, %v168_v24  ;;  %v171_v30 = vmul.u32 8, %v168_v24  ;;  %424 = vset.pattern.permute.xlu1 %v515_v41 }
  0x2b   :  { %406 = vmatprep.subr.bf16.mxu0 %v405_v6  ;;  %v361_v37 = vld [vmem:[%s599_s1] ss:$0 sm:$0xff]  ;;  %425 = vset.pattern.permute.xlu0 %v515_v41  ;;  %s516_s1 = smov [#allocation7]  }
  0x2c   :  { %v174_v31 = vmul.u32 8, %v173_v27  ;;  %vm172_vm2 = vcmp.ge.s32.totalorder %v170_v29, %v171_v30  ;;  %s346_s21 = sshll.u32 %s516_s1, 4  ;;  %s347_s21 = int_to_ptr.vmem [resolvable:$true] %s346_s21 }
  0x2d   :  { %s480_s22 = scalar_lea.vmem %s347_s21, 32  ;;  %p485_p3 = scmp.lt.s32.totalorder %s347_s21, %s347_s21 }
  0x2e   :  { %408 = vmatpush3.bf16.msra.mxu0 %v405_v6  ;;  %vm175_vm3 = vcmp.lt.s32.totalorder %v170_v29, %v174_v31  ;;  %p481_p2 = scmp.ne.s32.totalorder %s347_s21, %s480_s22  ;;  %p486_p4 = scmp.lt.s32.totalorder %s480_s22, %s480_s22 }
  0x2f   :  { %vm176_vm4 = vmand %vm172_vm2, %vm175_vm3 }
  0x30   :  { %v360_v36 = vsel %vm176_vm4, 1.0, %v514_v21  ;;  %p487_p5 = por %p486_p4, %p485_p3 }
  0x31   :  { %385 = vmatmul.mubr.msk.f32.vlgmr.msra.gmra.mrb[0].mxu0 %vm62_vm0, %v50_v7  ;;  %v186_v39 = vmul.f32 %v361_v37, %v360_v36 }
  0x32   :  { %p488_p6 = pnand %p487_p5, %p481_p2 }
 0x104   :  { %v386_v9 = vpop.f32.mrb[0].mxu0 }
 0x105   :  { %v141_v10 = vadd.f32 %v386_v9, %v356_v8  ;;  %v135_v11 = vpop.f32.mrb[1].mxu0 }
 0x106   :  { %v136_v12 = vadd.f32 %v356_v8, %v135_v11 }
 0x107   :  { %426 = vtanh.f32 %v141_v10 }
 0x108   :  { %428 = vtanh.f32 %v136_v12 }
 0x111   :  { %v427_v14 = vpop.eup %426 }
 0x112   :  { %v429_v15 = vpop.eup %428  ;;  %v154_v18 = vmul.f32 %v427_v14, %v359_v13 }
 0x113   :  { %v153_v16 = vmul.f32 %v429_v15, %v359_v13 }
 0x114   :  { %v158_v19 = vsel %vm62_vm0, %v154_v18, 0.0 }
 0x115   :  { %v155_v17 = vsel %vm62_vm0, %v153_v16, 0.0 }
 0x116   :  { %156 = vadd.xlane.f32.xlu0 %v155_v17 }
 0x11a   :  { %159 = vadd.xlane.f32.xlu0 %v158_v19 }
 0x1a3   :  { %v157_v23 = vpop.xlane.xlu0 %156 }
 0x1a4   :  { %v161_v25 = vmul.f32 1.442695, %v157_v23 }
 0x1a6   :  { %430 = vpow2.f32 %v161_v25 }
 0x1a7   :  { %v160_v26 = vpop.xlane.xlu0 %159 }
 0x1a8   :  { %v163_v28 = vmul.f32 1.442695, %v160_v26 }
 0x1aa   :  { %432 = vpow2.f32 %v163_v28 }
 0x1b0   :  { %v431_v32 = vpop.eup %430 }
 0x1b1   :  { %v165_v34 = vmul.f32 %v431_v32, %v49_v5 }
 0x1b4   :  { %v433_v33 = vpop.eup %432 }
 0x1b5   :  { %v166_v35 = vmul.f32 %v433_v33, %v50_v7  ;;  %v413_v40 = vpack.c.bf16 %v433_v33, %v431_v32 }
 0x1b7   :  { %v410_v38 = vpack.c.bf16 %v166_v35, %v165_v34 }
 0x1b9   :  { %411 = vmatpush3.bf16.msra.mxu1 %v410_v38 }
 0x1ba   :  { %412 = vmatprep.subr.bf16.mxu1 %v512_v20 }
 0x1bc   :  { %392 = vmatmul.mubr.msk.f32.vlgmr.msra.gmra.mrb[0].mxu1 %vm187_vm5, %v186_v39 }
 0x1bd   :  { %414 = vmatpush3.bf16.msra.mxu1 %v413_v40  ;;  %398 = vmatprep.mubr.msk.f32.mxu1 %vm513_vm1, %v514_v21 }
 0x1c0   :  { %399 = vmatmul.mubr.msk.f32.vlgmr.msra.gmra.mrb[2].mxu1 %vm187_vm5, %v186_v39 }
 0x28f   :  { %v257_v42 = vpop.f32.mrb[0].mxu1 }
 0x290   :  { %v393_v43 = vpop.f32.mrb[1].mxu1 }
 0x293   :  { %v327_v44 = vpop.f32.mrb[2].mxu1 }
 0x294   :  { %v328_v45 = vadd.f32 1e-08, %v327_v44  ;;  %v400_v46 = vpop.f32.mrb[3].mxu1 }
 0x296   :  { %333 = vperm.xlu1 %424, %v328_v45  }
 0x315   :  { %v334_v47 = vpop.permute.xlu1 %333 }
 0x316   :  { %434 = vrcp.f32 %v334_v47 }
 0x320   :  { %v435_v48 = vpop.eup %434 }
 0x321   :  { %v337_v49 = vmul.f32 %v435_v48, %v257_v42 }
 0x323   :  { %339 = vst.msk [vmem:[#allocation7] sm:$0x3] %vm338_vm6, %v337_v49 }
 0x324   :  { %491 = shalt.err (!%p488_p6)
}
 0x325   :  { %s492_s25 = scalar_lea.hbm %s603_s5, 32 }
 0x326   :  { %p493_p7 = scmp.ne.s32.totalorder %s603_s5, %s492_s25  ;;  %p496_p8 = scmp.lt.u32.totalorder %s492_s25, %s603_s5 }
 0x328   :  { %p498_p9 = pnand %p496_p8, %p493_p7 }
 0x32a   :  { %501 = shalt.err (!%p498_p9)
}
 0x32b   :  { %349 = dma.vmem_to_hbm [thread:$0]  %s347_s21, 32, %s603_s5, [#allocation4]  }
 0x32c   :  { %506 = dma.done.wait [#allocation4], 32  }
 0x32d   :  { %507 = vsyncadd [#allocation4], 4294967264 }
 0x32e   :  { %353 = vsyncpa [#allocation3], 1 }
 0x32f   :  { %354 = vsyncpa [#allocation6], 1 }
 0x330   :  { %355 = vsyncpa [#allocation4], 1 }

</bundles_post_ra>
